<compile_context>
chip_gen: v7x
topology: tpu7x:2x2x1
jax: 0.10.0
libtpu: 0.0.40
codegen_flags: <defaults>
</compile_context>

<pallas_src>
import functools

import jax
import jax.numpy as jnp
from jax.experimental import pallas as pl
from jax.experimental.pallas import tpu as pltpu


def _cad_embedding_kernel(*refs, arg_num, args_dim, cmd_off, need_pos):
    """One grid step = NB batch elements (NB*S rows). Fused table resident in VMEM."""
    if need_pos:
        idx_ref, table_ref, pos_ref, o_ref = refs
    else:
        idx_ref, table_ref, o_ref = refs
        pos_ref = None

    NB, S, _ = idx_ref.shape          # idx: (NB, S, A+1), column 0 = command
    K, D = table_ref.shape            # fused table: (K, d_model)
    R = NB * S

    idx = idx_ref[...].reshape(R, arg_num + 1)                      # int32, layout-cheap
    k_iota = jax.lax.broadcasted_iota(jnp.int32, (R, K), 1)         # (R, K)

    # Combined multi-hot: command hit in columns [0, C), slot-a hit in
    # columns [C + a*V, C + (a+1)*V).  Pure VPU compares/ORs, mutually exclusive.
    hit = k_iota == idx[:, 0:1]
    for a in range(arg_num):                                        # A small, static unroll
        target = idx[:, a + 1:a + 2] + (1 + cmd_off + a * args_dim)  # (args + 1) shift
        hit = jnp.logical_or(hit, k_iota == target)

    multi_hot = hit.astype(jnp.float32)                             # (R, K) lane dense
    out = jnp.dot(multi_hot, table_ref[...],
                  preferred_element_type=jnp.float32)               # one full-K MXU matmul
    out = out.reshape(NB, S, D)

    if need_pos:
        out = out + pos_ref[...][None, :, :]                        # (S, D) broadcast add

    o_ref[...] = out


def prepare_cad_embedding_params(params):
    """One-time prep (hoist out of the forward): build the fused weight table.

    params (torch conventions):
      cmd_w : (command_type_num, d_model)   command_embedding.weight
      arg_w : (args_dim, 64)                arg_embed.weight (row 0 = padding_idx)
      w_fcn : (d_model, 64*arg_num)         embed_fcn.weight (out, in)
      b_fcn : (d_model,)                    embed_fcn.bias
      pos_w : (max_path, d_model)           position_embedding.embedding.weight (optional)
    """
    cmd_w = params["cmd_w"].astype(jnp.float32)
    arg_w = params["arg_w"].astype(jnp.float32)
    w_fcn = params["w_fcn"].astype(jnp.float32)
    b_fcn = params["b_fcn"].astype(jnp.float32)

    C, D = cmd_w.shape
    V = arg_w.shape[0]
    A = w_fcn.shape[1] // 64

    # Per-slot fused arg table: W_arg[a*V + v, :] = arg_w[v] @ w_fcn[:, 64a:64(a+1)].T
    w_fcn_t = w_fcn.T.reshape(A, 64, D)                              # (A, 64, D)
    w_arg = jnp.einsum("ve,aed->avd", arg_w, w_fcn_t).reshape(A * V, D)

    k_raw = C + A * V
    k_tot = ((k_raw + 127) // 128) * 128                             # lane-dense K
    table = jnp.zeros((k_tot, D), jnp.float32)
    table = table.at[:C].set(cmd_w + b_fcn[None, :])                 # bias folded into cmd rows
    table = table.at[C:k_raw].set(w_arg)

    fused = {
        "table": table,
        "arg_num": A,
        "args_dim": V,
        "cmd_off": C,
        "d_model": D,
    }
    if "pos_w" in params and params["pos_w"] is not None:
        fused["pos_w"] = params["pos_w"].astype(jnp.float32)
    return fused


def cad_embedding(commands, args, fused, *, need_pos=False, rows_per_step=512):
    """commands: (N, S) int, args: (N, S, A) int with values in [-1, arg_dim-1]."""
    N, S = commands.shape
    A = fused["arg_num"]
    C = fused["cmd_off"]
    V = fused["args_dim"]
    D = fused["d_model"]
    assert args.shape == (N, S, A)

    # Merge commands + args into one dense int32 index operand (col 0 = command).
    idx = jnp.concatenate(
        [commands.reshape(N, S, 1).astype(jnp.int32), args.astype(jnp.int32)],
        axis=-1)                                                     # (N, S, A+1)

    table = fused["table"]
    K = table.shape[0]

    # ~512 rows per grid step (review: amortize per-step overhead, fill MXU sublanes).
    NB = max(1, min(N, rows_per_step // max(S, 1)))
    grid = (pl.cdiv(N, NB),)

    operands = [idx, table]
    in_specs = [
        pl.BlockSpec((NB, S, A + 1), lambda b: (b, 0, 0)),           # per-step indices
        pl.BlockSpec((K, D), lambda b: (0, 0)),                      # fused table (resident)
    ]
    if need_pos:
        # position rows are identical across batch: pos()[:N,:S,:] == pos_w[:S] broadcast.
        operands.append(fused["pos_w"][:S])
        in_specs.append(pl.BlockSpec((S, D), lambda b: (0, 0)))      # resident

    kernel = functools.partial(_cad_embedding_kernel, arg_num=A, args_dim=V,
                               cmd_off=C, need_pos=need_pos)

    return pl.pallas_call(
        kernel,
        out_shape=jax.ShapeDtypeStruct((N, S, D), jnp.float32),
        grid_spec=pltpu.PrefetchScalarGridSpec(
            num_scalar_prefetch=0,
            grid=grid,
            in_specs=in_specs,
            out_specs=pl.BlockSpec((NB, S, D), lambda b: (b, 0, 0)),
        ),
        compiler_params=pltpu.CompilerParams(
            dimension_semantics=("parallel",)),
    )(*operands)


def _reference(commands, args, params, need_pos):
    """Pure-JAX replica of the PyTorch forward for verification."""
    N, S = commands.shape
    cmd_emb = params["cmd_w"][commands]                               # (N, S, D)
    arg_emb = params["arg_w"][args + 1]                               # (N, S, A, 64)
    arg_flat = arg_emb.reshape(N, S, -1)
    out = cmd_emb + arg_flat @ params["w_fcn"].T + params["b_fcn"]
    if need_pos:
        out = out + params["pos_w"][:S][None, :, :]
    return out


if __name__ == "__main__":
    # Small shapes consistent with the module, chosen lane/sublane friendly.
    N, S, D = 2, 16, 256          # batch, seq, d_model
    C = 8                         # command_type_num
    A = 4                         # arg_num  -> 64*A = 256
    ARG_DIM = 63                  # config.arg_dim; args_dim = ARG_DIM + 1 = 64
    V = ARG_DIM + 1
    MAX_PATH = 32                 # config.max_path >= S

    key = jax.random.PRNGKey(0)
    ks = jax.random.split(key, 8)

    arg_w = jax.random.normal(ks[1], (V, 64), jnp.float32) * 0.02
    arg_w = arg_w.at[0].set(0.0)  # nn.Embedding(padding_idx=0) zero row

    params = {
        "cmd_w": jax.random.normal(ks[0], (C, D), jnp.float32) * 0.02,
        "arg_w": arg_w,
        "w_fcn": jax.random.normal(ks[2], (D, 64 * A), jnp.float32) * 0.02,
        "b_fcn": jax.random.normal(ks[3], (D,), jnp.float32) * 0.02,
        "pos_w": jax.random.normal(ks[4], (MAX_PATH, D), jnp.float32) * 0.02,
    }

    commands = jax.random.randint(ks[5], (N, S), 0, C, dtype=jnp.int32)
    # args values in [-1, ARG_DIM - 1]; forward does (args + 1), -1 -> padding row 0.
    args = jax.random.randint(ks[6], (N, S, A), -1, ARG_DIM, dtype=jnp.int32)

    # One-time parameter prep (fused table, bias fold) -- hoisted out of forward.
    fused = prepare_cad_embedding_params(params)

    # need_pos=True path (full forward).
    out = cad_embedding(commands, args, fused, need_pos=True)
    out = jax.block_until_ready(out)
    ref = _reference(commands, args, params, need_pos=True)
    assert out.shape == (N, S, D)
    err = float(jnp.max(jnp.abs(out - ref)))
    assert jnp.allclose(out, ref, atol=1e-4, rtol=1e-4), err

    # need_pos=False path.
    out2 = jax.block_until_ready(cad_embedding(commands, args, fused, need_pos=False))
    ref2 = _reference(commands, args, params, need_pos=False)
    err2 = float(jnp.max(jnp.abs(out2 - ref2)))
    assert jnp.allclose(out2, ref2, atol=1e-4, rtol=1e-4), err2

    print("KERNEL_OK")
</pallas_src>

<mosaic_0001>
module attributes {stable_mosaic.version = 11 : i64} {
  func.func @_cad_embedding_kernel(%arg0: i32, %arg1: memref<2x16x5xi32, #tpu.memory_space<vmem>>, %arg2: memref<384x256xf32, #tpu.memory_space<vmem>>, %arg3: memref<16x256xf32, #tpu.memory_space<vmem>>, %arg4: memref<2x16x256xf32, #tpu.memory_space<vmem>>) attributes {dimension_semantics = [#tpu.dimension_semantics<parallel>], iteration_bounds = array<i64: 1>, scalar_prefetch = 0 : i64, scratch_operands = 0 : i64, tpu.core_type = #tpu.core_type<tc>, window_params = [{transform_indices = @transform_0, window_bounds = array<i64: 2, 16, 5>}, {pipeline_mode = #tpu.pipeline_mode<synchronous>, transform_indices = @transform_1, window_bounds = array<i64: 384, 256>}, {pipeline_mode = #tpu.pipeline_mode<synchronous>, transform_indices = @transform_2, window_bounds = array<i64: 16, 256>}, {transform_indices = @transform_3, window_bounds = array<i64: 2, 16, 256>}]} {
    %c0 = arith.constant 0 : index
    %c0_0 = arith.constant 0 : index
    %c0_1 = arith.constant 0 : index
    %0 = vector.load %arg1[%c0, %c0_0, %c0_1] : memref<2x16x5xi32, #tpu.memory_space<vmem>>, vector<2x16x5xi32>
    %1 = vector.shape_cast %0 : vector<2x16x5xi32> to vector<32x5xi32>
    %2 = tpu.iota {dimensions = array<i32: 1>} : vector<32x384xi32>
    %3 = vector.extract_strided_slice %1 {offsets = [0, 0], sizes = [32, 1], strides = [1, 1]} : vector<32x5xi32> to vector<32x1xi32>
    %4 = vector.broadcast %3 : vector<32x1xi32> to vector<32x384xi32>
    %5 = arith.cmpi eq, %2, %4 : vector<32x384xi32>
    %6 = vector.extract_strided_slice %1 {offsets = [0, 1], sizes = [32, 1], strides = [1, 1]} : vector<32x5xi32> to vector<32x1xi32>
    %c9_i32 = arith.constant 9 : i32
    %7 = vector.broadcast %c9_i32 : i32 to vector<32x1xi32>
    %8 = arith.addi %6, %7 : vector<32x1xi32>
    %9 = vector.broadcast %8 : vector<32x1xi32> to vector<32x384xi32>
    %10 = arith.cmpi eq, %2, %9 : vector<32x384xi32>
    %11 = arith.ori %5, %10 : vector<32x384xi1>
    %12 = vector.extract_strided_slice %1 {offsets = [0, 2], sizes = [32, 1], strides = [1, 1]} : vector<32x5xi32> to vector<32x1xi32>
    %c73_i32 = arith.constant 73 : i32
    %13 = vector.broadcast %c73_i32 : i32 to vector<32x1xi32>
    %14 = arith.addi %12, %13 : vector<32x1xi32>
    %15 = vector.broadcast %14 : vector<32x1xi32> to vector<32x384xi32>
    %16 = arith.cmpi eq, %2, %15 : vector<32x384xi32>
    %17 = arith.ori %11, %16 : vector<32x384xi1>
    %18 = vector.extract_strided_slice %1 {offsets = [0, 3], sizes = [32, 1], strides = [1, 1]} : vector<32x5xi32> to vector<32x1xi32>
    %c137_i32 = arith.constant 137 : i32
    %19 = vector.broadcast %c137_i32 : i32 to vector<32x1xi32>
    %20 = arith.addi %18, %19 : vector<32x1xi32>
    %21 = vector.broadcast %20 : vector<32x1xi32> to vector<32x384xi32>
    %22 = arith.cmpi eq, %2, %21 : vector<32x384xi32>
    %23 = arith.ori %17, %22 : vector<32x384xi1>
    %24 = vector.extract_strided_slice %1 {offsets = [0, 4], sizes = [32, 1], strides = [1, 1]} : vector<32x5xi32> to vector<32x1xi32>
    %c201_i32 = arith.constant 201 : i32
    %25 = vector.broadcast %c201_i32 : i32 to vector<32x1xi32>
    %26 = arith.addi %24, %25 : vector<32x1xi32>
    %27 = vector.broadcast %26 : vector<32x1xi32> to vector<32x384xi32>
    %28 = arith.cmpi eq, %2, %27 : vector<32x384xi32>
    %29 = arith.ori %23, %28 : vector<32x384xi1>
    %30 = arith.extui %29 : vector<32x384xi1> to vector<32x384xi32>
    %31 = arith.sitofp %30 : vector<32x384xi32> to vector<32x384xf32>
    %c0_2 = arith.constant 0 : index
    %c0_3 = arith.constant 0 : index
    %32 = vector.load %arg2[%c0_2, %c0_3] : memref<384x256xf32, #tpu.memory_space<vmem>>, vector<384x256xf32>
    %cst = arith.constant dense<0.000000e+00> : vector<32x256xf32>
    %33 = tpu.matmul %31, %32, %cst {dimension_numbers = #tpu.dot_dimension_numbers<[1], [0], [0], [1], [0, 0, 1, 1], [], []>} : vector<32x384xf32>, vector<384x256xf32>, vector<32x256xf32> -> vector<32x256xf32>
    %34 = vector.shape_cast %33 : vector<32x256xf32> to vector<2x16x256xf32>
    %c0_4 = arith.constant 0 : index
    %c0_5 = arith.constant 0 : index
    %35 = vector.load %arg3[%c0_4, %c0_5] : memref<16x256xf32, #tpu.memory_space<vmem>>, vector<16x256xf32>
    %36 = vector.shape_cast %35 : vector<16x256xf32> to vector<1x16x256xf32>
    %37 = vector.broadcast %36 : vector<1x16x256xf32> to vector<2x16x256xf32>
    %38 = arith.addf %34, %37 : vector<2x16x256xf32>
    %c0_6 = arith.constant 0 : index
    %c0_7 = arith.constant 0 : index
    %c0_8 = arith.constant 0 : index
    %39 = vector.load %arg4[%c0_6, %c0_7, %c0_8] : memref<2x16x256xf32, #tpu.memory_space<vmem>>, vector<2x16x256xf32>
    tpu.vector_store %arg4[%c0_6, %c0_7, %c0_8], %38 {strides = array<i32>} : memref<2x16x256xf32, #tpu.memory_space<vmem>>, vector<2x16x256xf32>,
    return
  }
  func.func @transform_0(%arg0: i32) -> (i32, i32, i32) {
    %c0_i32 = arith.constant 0 : i32
    %c0_i32_0 = arith.constant 0 : i32
    %c0_i32_1 = arith.constant 0 : i32
    return %arg0, %c0_i32, %c0_i32_0 : i32, i32, i32
  }
  func.func @transform_1(%arg0: i32) -> (i32, i32) {
    %c0_i32 = arith.constant 0 : i32
    %c0_i32_0 = arith.constant 0 : i32
    %c0_i32_1 = arith.constant 0 : i32
    return %c0_i32, %c0_i32_0 : i32, i32
  }
  func.func @transform_2(%arg0: i32) -> (i32, i32) {
    %c0_i32 = arith.constant 0 : i32
    %c0_i32_0 = arith.constant 0 : i32
    %c0_i32_1 = arith.constant 0 : i32
    return %c0_i32, %c0_i32_0 : i32, i32
  }
  func.func @transform_3(%arg0: i32) -> (i32, i32, i32) {
    %c0_i32 = arith.constant 0 : i32
    %c0_i32_0 = arith.constant 0 : i32
    %c0_i32_1 = arith.constant 0 : i32
    return %arg0, %c0_i32, %c0_i32_0 : i32, i32, i32
  }
}

</mosaic_0001>

<bundles_post_ra>
// kernel: tpu_custom_call.1
= control target key start
LH: loop header
LB: loop body
LE: loop exit
PB: predicated region body
PF: predicated region fallthrough
CT: control target
= control target key end

     0   :  { %8 = vsyncpa [#allocation3], 0  ;;  %s1016_s0 = inlined_call_operand.vmem [shape: s32[2,16,5], index: 0, kind: input, shape index: {}]   ;;  %s1017_s1 = inlined_call_operand.hbm [shape: f32[384,256], index: 1, kind: input, shape index: {}]   ;;  %s1018_s2 = inlined_call_operand.vmem [shape: f32[16,256], index: 2, kind: input, shape index: {}]   ;;  %s1019_s3 = inlined_call_operand.hbm [shape: f32[2,16,256], index: 3, kind: output, shape index: {}]  }
   0x1   :  { %9 = vsyncpa [#allocation4], 0  ;;  %s749_s12 = smov [#allocation2]   ;;  %s701_s16 = scalar_lea.hbm %s1017_s1, 12288 }
   0x2   :  { %s17_s13 = sshll.u32 %s749_s12, 4  ;;  %p702_p0 = scmp.ne.s32.totalorder %s1017_s1, %s701_s16  ;;  %s18_s13 = int_to_ptr.vmem [resolvable:$true] %s17_s13 }
   0x3   :  { %p705_p1 = scmp.lt.u32.totalorder %s701_s16, %s1017_s1 }
   0x5   :  { %p707_p2 = pnand %p705_p1, %p702_p0 }
   0x7   :  { %710 = shalt.err (!%p707_p2)
}
   0x8   :  { %s711_s21 = scalar_lea.vmem %s18_s13, 12288  ;;  %p716_p4 = scmp.lt.s32.totalorder %s18_s13, %s18_s13 }
   0x9   :  { %p712_p3 = scmp.ne.s32.totalorder %s18_s13, %s711_s21  ;;  %p717_p5 = scmp.lt.s32.totalorder %s711_s21, %s711_s21 }
   0xb   :  { %p718_p6 = por %p717_p5, %p716_p4 }
   0xd   :  { %p719_p7 = pnand %p718_p6, %p712_p3 }
   0xf   :  { %722 = shalt.err (!%p719_p7)
}
  0x10   :  { %s750_s22 = smov 256   ;;  %s751_s23 = smov 16  }
  0x11   :  { %23 = dma.hbm_to_vmem [thread:$0]  %s1017_s1, 12288, %s18_s13, [#allocation3], %s750_s22, %s750_s22, %s751_s23  }
  0x12   :  { %745 = dma.done.wait [#allocation3], 12288  }
  0x13   :  { %746 = vsyncadd [#allocation3], 4294955008  ;;  %v752_v0 = vmov 0   ;;  %v753_v1 = vmov 2   ;;  %v29_v2 = vld [vmem:[%s1016_s0] sm:$0xff]  ;;  %v802_v4 = vld [vmem:[%s1016_s0 + $0x8] sm:$0xff] }
  0x14   :  { %682 = vset.pattern.permute.xlu0 %v752_v0  ;;  %683 = vset.pattern.permute.xlu1 %v753_v1  ;;  %v101_v3 = vadd.s32 73, %v29_v2  ;;  %v246_v5 = vld [vmem:[#allocation2 + $0x8] sm:$0xff]  ;;  %v248_v6 = vld [vmem:[#allocation2 + $0x18] sm:$0xff]  ;;  %v245_v7 = vld [vmem:[#allocation2] sm:$0xff]  ;;  %v141_v10 = vadd.s32 137, %v29_v2  ;;  %v142_v17 = vadd.s32 137, %v802_v4 }
  0x15   :  { %38 = vperm.xlu0 %682, %v29_v2   ;;  %v247_v8 = vld [vmem:[#allocation2 + $0x10] sm:$0xff]  ;;  %v250_v9 = vld [vmem:[#allocation2 + $0x28] sm:$0xff]  ;;  %v252_v11 = vld [vmem:[#allocation2 + $0x38] sm:$0xff]  ;;  %v568_v12 = vpack.c.bf16 %v248_v6, %v246_v5  ;;  %v754_v20 = vmov 3   ;;  %v181_v22 = vadd.s32 201, %v29_v2  ;;  %v61_v28 = vadd.s32 9, %v29_v2 }
  0x16   :  { %106 = vperm.xlu1 %683, %v101_v3   ;;  %v570_v13 = vpack.c.bf16 %v247_v8, %v245_v7  ;;  %v572_v14 = vpack.c.bf16 %v252_v11, %v250_v9  ;;  %v249_v15 = vld [vmem:[#allocation2 + $0x20] sm:$0xff]  ;;  %v251_v16 = vld [vmem:[#allocation2 + $0x30] sm:$0xff]  ;;  %v254_v18 = vld [vmem:[#allocation2 + $0x48] sm:$0xff]  ;;  %v755_v29 = vmov 4   ;;  %v756_v37 = vmov 1  }
  0x17   :  { %v256_v19 = vld [vmem:[#allocation2 + $0x58] sm:$0xff]  ;;  %569 = vmatprep.subr.bf16.mxu1 %v568_v12  ;;  %v574_v21 = vpack.c.bf16 %v251_v16, %v249_v15  ;;  %v253_v24 = vld [vmem:[#allocation2 + $0x40] sm:$0xff]  ;;  %v255_v25 = vld [vmem:[#allocation2 + $0x50] sm:$0xff]  ;;  %v62_v38 = vadd.s32 9, %v802_v4  ;;  %v102_v59 = vadd.s32 73, %v802_v4  ;;  %v182_v16 = vadd.s32 201, %v802_v4 }
  0x18   :  { %571 = vmatpush1.bf16.msra.mxu1 %v570_v13  ;;  %v576_v23 = vpack.c.bf16 %v256_v19, %v254_v18  ;;  %v258_v26 = vld [vmem:[#allocation2 + $0x68] sm:$0xff]  ;;  %v260_v27 = vld [vmem:[#allocation2 + $0x78] sm:$0xff]  ;;  %v812_v30 = vld [vmem:[%s1016_s0 + $0x10] sm:$0xff]  ;;  %v578_v31 = vpack.c.bf16 %v255_v25, %v253_v24 }
  0x19   :  { %41 = vperm.xlu0 %682, %v802_v4   ;;  %573 = vmatprep.subr.bf16.mxu1 %v572_v14  ;;  %v257_v32 = vld [vmem:[#allocation2 + $0x60] sm:$0xff]  ;;  %v580_v33 = vpack.c.bf16 %v260_v27, %v258_v26  ;;  %v259_v34 = vld [vmem:[#allocation2 + $0x70] sm:$0xff]  ;;  %v310_v35 = vld [vmem:[#allocation2 + $0x208] sm:$0xff]  ;;  %v63_v43 = vadd.s32 9, %v812_v30  ;;  %v183_v61 = vadd.s32 201, %v812_v30  ;;  %v757_v27 = vmov 0.0  }
  0x1a   :  { %684 = vset.pattern.permute.xlu1 %v754_v20  ;;  %v312_v36 = vld [vmem:[#allocation2 + $0x218] sm:$0xff]  ;;  %v262_v39 = vld [vmem:[#allocation2 + $0x88] sm:$0xff]  ;;  %v309_v42 = vld [vmem:[#allocation2 + $0x200] sm:$0xff]  ;;  %v582_v45 = vpack.c.bf16 %v259_v34, %v257_v32  ;;  %494 = vmatprep.mubr.f32.mxu0 %v757_v27 }
  0x1b   :  { %146 = vperm.xlu1 %684, %v141_v10   ;;  %v264_v40 = vld [vmem:[#allocation2 + $0x98] sm:$0xff]  ;;  %v632_v41 = vpack.c.bf16 %v312_v36, %v310_v35  ;;  %v311_v44 = vld [vmem:[#allocation2 + $0x210] sm:$0xff]  ;;  %v261_v46 = vld [vmem:[#allocation2 + $0x80] sm:$0xff] }
  0x1c   :  { %575 = vmatpush1.bf16.msra.mxu1 %v574_v21  ;;  %v634_v47 = vpack.c.bf16 %v311_v44, %v309_v42  ;;  %v314_v48 = vld [vmem:[#allocation2 + $0x228] sm:$0xff]  ;;  %v316_v49 = vld [vmem:[#allocation2 + $0x238] sm:$0xff]  ;;  %v584_v50 = vpack.c.bf16 %v264_v40, %v262_v39  ;;  %v263_v51 = vld [vmem:[#allocation2 + $0x90] sm:$0xff] }
  0x1d   :  { %688 = vset.pattern.permute.xlu0 %v754_v20  ;;  %577 = vmatprep.subr.bf16.mxu1 %v576_v23  ;;  %v636_v52 = vpack.c.bf16 %v316_v49, %v314_v48  ;;  %v313_v53 = vld [vmem:[#allocation2 + $0x220] sm:$0xff]  ;;  %v315_v54 = vld [vmem:[#allocation2 + $0x230] sm:$0xff]  ;;  %v266_v55 = vld [vmem:[#allocation2 + $0xa8] sm:$0xff]  ;;  %v586_v62 = vpack.c.bf16 %v263_v51, %v261_v46 }
  0x1e   :  { %149 = vperm.xlu0 %688, %v142_v17   ;;  %633 = vmatprep.subr.bf16.mxu0 %v632_v41  ;;  %v268_v56 = vld [vmem:[#allocation2 + $0xb8] sm:$0xff]  ;;  %v638_v57 = vpack.c.bf16 %v315_v54, %v313_v53  ;;  %v318_v58 = vld [vmem:[#allocation2 + $0x248] sm:$0xff]  ;;  %v317_v63 = vld [vmem:[#allocation2 + $0x240] sm:$0xff] }
  0x1f   :  { %685 = vset.pattern.permute.xlu1 %v755_v29  ;;  %635 = vmatpush1.bf16.msra.mxu0 %v634_v47  ;;  %v320_v60 = vld [vmem:[#allocation2 + $0x258] sm:$0xff]  ;;  %v319_v2 = vld [vmem:[#allocation2 + $0x250] sm:$0xff]  ;;  %v588_v3 = vpack.c.bf16 %v268_v56, %v266_v55  ;;  %v322_v6 = vld [vmem:[#allocation2 + $0x268] sm:$0xff] }
  0x20   :  { %186 = vperm.xlu1 %685, %v181_v22   ;;  %579 = vmatpush1.bf16.msra.mxu1 %v578_v31  ;;  %v640_v5 = vpack.c.bf16 %v320_v60, %v318_v58  ;;  %v324_v7 = vld [vmem:[#allocation2 + $0x278] sm:$0xff]  ;;  %v265_v8 = vld [vmem:[#allocation2 + $0xa0] sm:$0xff]  ;;  %v267_v9 = vld [vmem:[#allocation2 + $0xb0] sm:$0xff]  ;;  %v642_v11 = vpack.c.bf16 %v319_v2, %v317_v63 }
  0x21   :  { %581 = vmatprep.subr.bf16.mxu1 %v580_v33  ;;  %637 = vmatprep.subr.bf16.mxu0 %v636_v52  ;;  %v270_v10 = vld [vmem:[#allocation2 + $0xc8] sm:$0xff]  ;;  %v272_v12 = vld [vmem:[#allocation2 + $0xd8] sm:$0xff]  ;;  %v644_v13 = vpack.c.bf16 %v324_v7, %v322_v6  ;;  %v321_v14 = vld [vmem:[#allocation2 + $0x260] sm:$0xff]  ;;  %v590_v22 = vpack.c.bf16 %v267_v9, %v265_v8 }
  0x22   :  { %689 = vset.pattern.permute.xlu0 %v756_v37  ;;  %v323_v15 = vld [vmem:[#allocation2 + $0x270] sm:$0xff]  ;;  %v826_v17 = vld [vmem:[%s1016_s0 + $0x18] sm:$0xff]  ;;  %v326_v18 = vld [vmem:[#allocation2 + $0x288] sm:$0xff]  ;;  %v592_v23 = vpack.c.bf16 %v272_v12, %v270_v10 }
  0x23   :  { %66 = vperm.xlu0 %689, %v61_v28   ;;  %639 = vmatpush1.bf16.msra.mxu0 %v638_v57  ;;  %v328_v19 = vld [vmem:[#allocation2 + $0x298] sm:$0xff]  ;;  %v104_v21 = vadd.s32 73, %v826_v17  ;;  %v269_v24 = vld [vmem:[#allocation2 + $0xc0] sm:$0xff]  ;;  %v271_v25 = vld [vmem:[#allocation2 + $0xd0] sm:$0xff]  ;;  %v646_v4 = vpack.c.bf16 %v323_v15, %v321_v14 }
  0x24   :  { %686 = vset.pattern.permute.xlu1 %v756_v37  ;;  %583 = vmatpush1.bf16.msra.mxu1 %v582_v45  ;;  %v274_v26 = vld [vmem:[#allocation2 + $0xe8] sm:$0xff]  ;;  %v276_v28 = vld [vmem:[#allocation2 + $0xf8] sm:$0xff]  ;;  %v648_v31 = vpack.c.bf16 %v328_v19, %v326_v18  ;;  %v325_v32 = vld [vmem:[#allocation2 + $0x280] sm:$0xff]  ;;  %v594_v36 = vpack.c.bf16 %v271_v25, %v269_v24  ;;  %v64_v25 = vadd.s32 9, %v826_v17 }
  0x25   :  { %69 = vperm.xlu1 %686, %v62_v38   ;;  %585 = vmatprep.subr.bf16.mxu1 %v584_v50  ;;  %v327_v33 = vld [vmem:[#allocation2 + $0x290] sm:$0xff]  ;;  %v330_v34 = vld [vmem:[#allocation2 + $0x2a8] sm:$0xff]  ;;  %v332_v35 = vld [vmem:[#allocation2 + $0x2b8] sm:$0xff]  ;;  %v596_v38 = vpack.c.bf16 %v276_v28, %v274_v26  ;;  %v103_v50 = vadd.s32 73, %v812_v30 }
  0x26   :  { %641 = vmatprep.subr.bf16.mxu0 %v640_v5  ;;  %v273_v39 = vld [vmem:[#allocation2 + $0xe0] sm:$0xff]  ;;  %v275_v40 = vld [vmem:[#allocation2 + $0xf0] sm:$0xff]  ;;  %v650_v41 = vpack.c.bf16 %v327_v33, %v325_v32  ;;  %v278_v42 = vld [vmem:[#allocation2 + $0x108] sm:$0xff]  ;;  %v652_v44 = vpack.c.bf16 %v332_v35, %v330_v34  ;;  %v143_v5 = vadd.s32 137, %v812_v30  ;;  %v144_v34 = vadd.s32 137, %v826_v17 }
  0x27   :  { %72 = vperm.xlu0 %689, %v63_v43   ;;  %643 = vmatpush1.bf16.msra.mxu0 %v642_v11  ;;  %v280_v43 = vld [vmem:[#allocation2 + $0x118] sm:$0xff]  ;;  %v329_v45 = vld [vmem:[#allocation2 + $0x2a0] sm:$0xff]  ;;  %v331_v46 = vld [vmem:[#allocation2 + $0x2b0] sm:$0xff]  ;;  %v598_v47 = vpack.c.bf16 %v275_v40, %v273_v39 }
  0x28   :  { %587 = vmatpush1.bf16.msra.mxu1 %v586_v62  ;;  %645 = vmatprep.subr.bf16.mxu0 %v644_v13  ;;  %v334_v48 = vld [vmem:[#allocation2 + $0x2c8] sm:$0xff]  ;;  %v336_v49 = vld [vmem:[#allocation2 + $0x2d8] sm:$0xff]  ;;  %v600_v51 = vpack.c.bf16 %v280_v43, %v278_v42  ;;  %v277_v52 = vld [vmem:[#allocation2 + $0x100] sm:$0xff]  ;;  %v654_v56 = vpack.c.bf16 %v331_v46, %v329_v45 }
  0x29   :  { %687 = vset.pattern.permute.xlu1 %v753_v1  ;;  %589 = vmatprep.subr.bf16.mxu1 %v588_v3  ;;  %v279_v53 = vld [vmem:[#allocation2 + $0x110] sm:$0xff]  ;;  %v282_v54 = vld [vmem:[#allocation2 + $0x128] sm:$0xff]  ;;  %v284_v55 = vld [vmem:[#allocation2 + $0x138] sm:$0xff]  ;;  %v656_v57 = vpack.c.bf16 %v336_v49, %v334_v48 }
  0x2a   :  { %109 = vperm.xlu1 %687, %v102_v59   ;;  %v333_v58 = vld [vmem:[#allocation2 + $0x2c0] sm:$0xff]  ;;  %v335_v59 = vld [vmem:[#allocation2 + $0x2d0] sm:$0xff]  ;;  %v602_v60 = vpack.c.bf16 %v279_v53, %v277_v52  ;;  %v340_v62 = vld [vmem:[#allocation2 + $0x2f8] sm:$0xff]  ;;  %v604_v63 = vpack.c.bf16 %v284_v55, %v282_v54  ;;  %v33_v53 = vlaneseq }
  0x2b   :  { %694 = vset.pattern.permute.xlu0 %v755_v29  ;;  %647 = vmatpush1.bf16.msra.mxu0 %v646_v4  ;;  %v281_v2 = vld [vmem:[#allocation2 + $0x120] sm:$0xff]  ;;  %v283_v3 = vld [vmem:[#allocation2 + $0x130] sm:$0xff]  ;;  %v286_v6 = vld [vmem:[#allocation2 + $0x148] sm:$0xff]  ;;  %v658_v8 = vpack.c.bf16 %v335_v59, %v333_v58 }
  0x2c   :  { %192 = vperm.xlu0 %694, %v183_v61   ;;  %591 = vmatpush1.bf16.msra.mxu1 %v590_v22  ;;  %v338_v61 = vld [vmem:[#allocation2 + $0x2e8] sm:$0xff]  ;;  %v288_v7 = vld [vmem:[#allocation2 + $0x158] sm:$0xff]  ;;  %v337_v10 = vld [vmem:[#allocation2 + $0x2e0] sm:$0xff]  ;;  %v847_v55 = vand.u32 127, %v33_v53 }
  0x2d   :  { %593 = vmatprep.subr.bf16.mxu1 %v592_v23  ;;  %649 = vmatprep.subr.bf16.mxu0 %v648_v31  ;;  %v660_v9 = vpack.c.bf16 %v340_v62, %v338_v61  ;;  %v339_v11 = vld [vmem:[#allocation2 + $0x2f0] sm:$0xff]  ;;  %v608_v12 = vpack.c.bf16 %v288_v7, %v286_v6  ;;  %v285_v13 = vld [vmem:[#allocation2 + $0x140] sm:$0xff]  ;;  %v290_v15 = vld [vmem:[#allocation2 + $0x168] sm:$0xff] }
  0x2e   :  { %690 = vset.pattern.permute.xlu1 %v755_v29  ;;  %v287_v14 = vld [vmem:[#allocation2 + $0x150] sm:$0xff]  ;;  %v294_v23 = vld [vmem:[#allocation2 + $0x188] sm:$0xff]  ;;  %v296_v24 = vld [vmem:[#allocation2 + $0x198] sm:$0xff]  ;;  %v855_v58 = vadd.s32 128, %v847_v55 }
  0x2f   :  { %189 = vperm.xlu1 %690, %v182_v16   ;;  %651 = vmatpush1.bf16.msra.mxu0 %v650_v41  ;;  %v292_v16 = vld [vmem:[#allocation2 + $0x178] sm:$0xff]  ;;  %v610_v18 = vpack.c.bf16 %v287_v14, %v285_v13  ;;  %v291_v22 = vld [vmem:[#allocation2 + $0x170] sm:$0xff]  ;;  %v616_v4 = vpack.c.bf16 %v296_v24, %v294_v23  ;;  %v293_v28 = vld [vmem:[#allocation2 + $0x180] sm:$0xff] }
  0x30   :  { %697 = vset.pattern.permute.xlu0 %v753_v1  ;;  %595 = vmatpush1.bf16.msra.mxu1 %v594_v36  ;;  %v612_v19 = vpack.c.bf16 %v292_v16, %v290_v15  ;;  %v295_v31 = vld [vmem:[#allocation2 + $0x190] sm:$0xff]  ;;  %v298_v32 = vld [vmem:[#allocation2 + $0x1a8] sm:$0xff]  ;;  %v300_v33 = vld [vmem:[#allocation2 + $0x1b8] sm:$0xff] }
  0x31   :  { %115 = vperm.xlu0 %697, %v104_v21   ;;  %597 = vmatprep.subr.bf16.mxu1 %v596_v38  ;;  %v289_v21 = vld [vmem:[#allocation2 + $0x160] sm:$0xff]  ;;  %v620_v35 = vpack.c.bf16 %v300_v33, %v298_v32  ;;  %v299_v38 = vld [vmem:[#allocation2 + $0x1b0] sm:$0xff]  ;;  %v302_v39 = vld [vmem:[#allocation2 + $0x1c8] sm:$0xff] }
  0x32   :  { %653 = vmatprep.subr.bf16.mxu0 %v652_v44  ;;  %v614_v26 = vpack.c.bf16 %v291_v22, %v289_v21  ;;  %v297_v36 = vld [vmem:[#allocation2 + $0x1a0] sm:$0xff]  ;;  %v304_v40 = vld [vmem:[#allocation2 + $0x1d8] sm:$0xff]  ;;  %v184_v44 = vadd.s32 201, %v826_v17  ;;  %v306_v45 = vld [vmem:[#allocation2 + $0x1e8] sm:$0xff]  ;;  %v1038_v21 = vmov 0 }
  0x33   :  { %691 = vset.pattern.permute.xlu1 %v752_v0  ;;  %655 = vmatpush1.bf16.msra.mxu0 %v654_v56  ;;  %v622_v41 = vpack.c.bf16 %v299_v38, %v297_v36  ;;  %v624_v42 = vpack.c.bf16 %v304_v40, %v302_v39  ;;  %v301_v43 = vld [vmem:[#allocation2 + $0x1c0] sm:$0xff]  ;;  %v308_v46 = vld [vmem:[#allocation2 + $0x1f8] sm:$0xff] }
  0x34   :  { %44 = vperm.xlu1 %691, %v812_v30   ;;  %599 = vmatpush1.bf16.msra.mxu1 %v598_v47  ;;  %v662_v30 = vpack.c.bf16 %v339_v11, %v337_v10  ;;  %v628_v48 = vpack.c.bf16 %v308_v46, %v306_v45  ;;  %v305_v49 = vld [vmem:[#allocation2 + $0x1e0] sm:$0xff]  ;;  %v521_v46 = vld [vmem:[%s1018_s2 + $0x10] sm:$0xff] }
  0x35   :  { %700 = vset.pattern.permute.xlu0 %v755_v29  ;;  %601 = vmatprep.subr.bf16.mxu1 %v600_v51  ;;  %v519_v38 = vld [vmem:[%s1018_s2] sm:$0xff] }
  0x36   :  { %657 = vmatprep.subr.bf16.mxu0 %v656_v57 }
  0x37   :  { %659 = vmatpush1.bf16.msra.mxu0 %v658_v8 }
  0x38   :  { %692 = vset.pattern.permute.xlu1 %v753_v1  ;;  %603 = vmatpush1.bf16.msra.mxu1 %v602_v60  ;;  %v606_v1 = vpack.c.bf16 %v283_v3, %v281_v2  ;;  %v1020_v60 = vmov 0 }
  0x39   :  { %112 = vperm.xlu1 %692, %v103_v50   ;;  %605 = vmatprep.subr.bf16.mxu1 %v604_v63  ;;  %v307_v50 = vld [vmem:[#allocation2 + $0x1f0] sm:$0xff]  ;;  %v1024_v63 = vmov 0 }
  0x3a   :  { %661 = vmatprep.subr.bf16.mxu0 %v660_v9 }
  0x3b   :  { %663 = vmatpush1.bf16.msra.mxu0 %v662_v30 }
  0x3c   :  { %607 = vmatpush1.bf16.msra.mxu1 %v606_v1 }
  0x3d   :  { %693 = vset.pattern.permute.xlu1 %v754_v20  ;;  %609 = vmatprep.subr.bf16.mxu1 %v608_v12 }
  0x3e   :  { %152 = vperm.xlu1 %693, %v143_v5  }
  0x40   :  { %611 = vmatpush1.bf16.msra.mxu1 %v610_v18 }
  0x41   :  { %613 = vmatprep.subr.bf16.mxu1 %v612_v19 }
  0x42   :  { %695 = vset.pattern.permute.xlu1 %v752_v0  ;;  %v618_v0 = vpack.c.bf16 %v295_v31, %v293_v28 }
  0x43   :  { %47 = vperm.xlu1 %695, %v826_v17  }
  0x44   :  { %615 = vmatpush1.bf16.msra.mxu1 %v614_v26 }
  0x45   :  { %617 = vmatprep.subr.bf16.mxu1 %v616_v4 }
  0x47   :  { %696 = vset.pattern.permute.xlu1 %v756_v37  ;;  %v303_v37 = vld [vmem:[#allocation2 + $0x1d0] sm:$0xff] }
  0x48   :  { %75 = vperm.xlu1 %696, %v64_v25   ;;  %619 = vmatpush1.bf16.msra.mxu1 %v618_v0  ;;  %v626_v47 = vpack.c.bf16 %v303_v37, %v301_v43 }
  0x49   :  { %621 = vmatprep.subr.bf16.mxu1 %v620_v35 }
  0x4c   :  { %698 = vset.pattern.permute.xlu1 %v754_v20  ;;  %623 = vmatpush1.bf16.msra.mxu1 %v622_v41  ;;  %v630_v20 = vpack.c.bf16 %v307_v50, %v305_v49  ;;  %v520_v41 = vld [vmem:[%s1018_s2 + $0x8] sm:$0xff]  ;;  %v522_v49 = vld [vmem:[%s1018_s2 + $0x18] sm:$0xff]  ;;  %s758_s2 = smov [#allocation5]  }
  0x4d   :  { %155 = vperm.xlu1 %698, %v144_v34   ;;  %625 = vmatprep.subr.bf16.mxu1 %v624_v42  ;;  %s544_s13 = sshll.u32 %s758_s2, 4  ;;  %s545_s13 = int_to_ptr.vmem [resolvable:$true] %s544_s13 }
  0x4e   :  { %s723_s14 = scalar_lea.vmem %s545_s13, 1024  ;;  %p728_p9 = scmp.lt.s32.totalorder %s545_s13, %s545_s13 }
  0x4f   :  { %p724_p8 = scmp.ne.s32.totalorder %s545_s13, %s723_s14  ;;  %p729_p10 = scmp.lt.s32.totalorder %s723_s14, %s723_s14 }
  0x50   :  { %627 = vmatpush1.bf16.msra.mxu1 %v626_v47 }
  0x51   :  { %699 = vset.pattern.permute.xlu1 %v755_v29  ;;  %629 = vmatprep.subr.bf16.mxu1 %v628_v48  ;;  %v852_v29 = vadd.s32 256, %v847_v55  ;;  %p730_p11 = por %p729_p10, %p728_p9 }
  0x52   :  { %195 = vperm.xlu1 %699, %v184_v44  }
  0x53   :  { %p731_p12 = pnand %p730_p11, %p724_p8 }
  0x54   :  { %631 = vmatpush1.bf16.msra.mxu1 %v630_v20 }
  0x94   :  { %v39_v51 = vpop.permute.xlu0 %38 }
  0x95   :  { %v107_v52 = vpop.permute.xlu1 %106  ;;  %vm51_vm0 = vcmp.eq.s32.totalorder %v852_v29, %v39_v51  ;;  %vm50_vm1 = vcmp.eq.s32.totalorder %v855_v58, %v39_v51  ;;  %vm49_vm5 = vcmp.eq.s32.totalorder %v847_v55, %v39_v51 }
  0x98   :  { %v42_v54 = vpop.permute.xlu0 %41 }
  0x99   :  { %vm52_vm4 = vcmp.eq.s32.totalorder %v847_v55, %v42_v54  ;;  %vm53_vm6 = vcmp.eq.s32.totalorder %v855_v58, %v42_v54  ;;  %vm54_vm9 = vcmp.eq.s32.totalorder %v852_v29, %v42_v54 }
  0x9a   :  { %v147_v17 = vpop.permute.xlu1 %146 }
  0x9d   :  { %v849_v56 = vpop.permute.xlu0 %149 }
  0x9f   :  { %v187_v57 = vpop.permute.xlu1 %186 }
  0xa2   :  { %v67_v59 = vpop.permute.xlu0 %66 }
  0xa3   :  { %vm78_vm2 = vcmp.eq.s32.totalorder %v855_v58, %v67_v59  ;;  %vm79_vm3 = vcmp.eq.s32.totalorder %v852_v29, %v67_v59  ;;  %vm77_vm7 = vcmp.eq.s32.totalorder %v847_v55, %v67_v59 }
  0xa4   :  { %vm865_vm8 = vmor %vm51_vm0, %vm79_vm3  ;;  %v70_v61 = vpop.permute.xlu1 %69  ;;  %vm118_vm3 = vcmp.eq.s32.totalorder %v855_v58, %v107_v52 }
  0xa5   :  { %v1021_v60 = vsel %vm865_vm8, 4294967295, %v1020_v60  ;;  %vm80_vm10 = vcmp.eq.s32.totalorder %v847_v55, %v70_v61  ;;  %vm81_vm11 = vcmp.eq.s32.totalorder %v855_v58, %v70_v61  ;;  %vm82_vm12 = vcmp.eq.s32.totalorder %v852_v29, %v70_v61  ;;  %vm90_vm13 = vmor %vm50_vm1, %vm78_vm2 }
  0xa6   :  { %vm873_vm14 = vmor %vm52_vm4, %vm80_vm10  ;;  %vm158_vm2 = vcmp.eq.s32.totalorder %v855_v58, %v147_v17  ;;  %v73_v13 = vpop.permute.xlu0 %72 }
  0xa7   :  { %vm877_vm15 = vmor %vm49_vm5, %vm77_vm7  ;;  %vm198_vm5 = vcmp.eq.s32.totalorder %v855_v58, %v187_v57  ;;  %vm119_vm7 = vcmp.eq.s32.totalorder %v852_v29, %v107_v52 }
  0xa8   :  { %v1025_v63 = vsel %vm877_vm15, 4294967295, %v1024_v63  ;;  %vm881_vm0 = vmor %vm53_vm6, %vm81_vm11  ;;  %vm159_vm6 = vcmp.eq.s32.totalorder %v852_v29, %v147_v17  ;;  %vm1030_vm11 = vnez %v1021_v60 }
  0xa9   :  { %vm886_vm8 = vmor %vm54_vm9, %vm82_vm12  ;;  %v110_v5 = vpop.permute.xlu1 %109 }
  0xaa   :  { %vm130_vm1 = vmor %vm90_vm13, %vm118_vm3  ;;  %vm120_vm12 = vcmp.eq.s32.totalorder %v847_v55, %v110_v5  ;;  %vm199_vm13 = vcmp.eq.s32.totalorder %v852_v29, %v187_v57  ;;  %vm122_vm15 = vcmp.eq.s32.totalorder %v852_v29, %v110_v5 }
  0xab   :  { %vm170_vm4 = vmor %vm130_vm1, %vm158_vm2  ;;  %vm121_vm1 = vcmp.eq.s32.totalorder %v855_v58, %v110_v5  ;;  %v193_v18 = vpop.permute.xlu0 %192 }
  0xac   :  { %vm210_vm10 = vmor %vm170_vm4, %vm198_vm5 }
  0xad   :  { %v557_v6 = vsel %vm210_vm10, 1.0, %v757_v27  ;;  %vm131_vm9 = vmor %vm1030_vm11, %vm119_vm7  ;;  %vm117_vm7 = vcmp.eq.s32.totalorder %v847_v55, %v107_v52 }
  0xae   :  { %405 = vmatprep.mubr.f32.mxu1 %v557_v6  ;;  %vm171_vm3 = vmor %vm131_vm9, %vm159_vm6  ;;  %v190_v7 = vpop.permute.xlu1 %189  ;;  %vm161_vm6 = vcmp.eq.s32.totalorder %v855_v58, %v849_v56  ;;  %vm197_vm9 = vcmp.eq.s32.totalorder %v847_v55, %v187_v57 }
  0xaf   :  { %vm211_vm2 = vmor %vm171_vm3, %vm199_vm13  ;;  %vm201_vm13 = vcmp.eq.s32.totalorder %v855_v58, %v190_v7  ;;  %vm202_vm3 = vcmp.eq.s32.totalorder %v852_v29, %v190_v7 }
  0xb0   :  { %v558_v8 = vsel %vm211_vm2, 1.0, %v757_v27  ;;  %vm904_vm4 = vmor %vm873_vm14, %vm120_vm12  ;;  %vm157_vm14 = vcmp.eq.s32.totalorder %v847_v55, %v147_v17  ;;  %vm160_vm2 = vcmp.eq.s32.totalorder %v847_v55, %v849_v56  ;;  %v116_v4 = vpop.permute.xlu0 %115 }
  0xb1   :  { %495 = vmatmul.mubr.f32.vlgmr.msra.gmra.mrb[0].mxu0 %v558_v8  ;;  %vm910_vm5 = vmor %vm881_vm0, %vm121_vm1  ;;  %vm1037_vm0 = vnez %v1025_v63 }
  0xb2   :  { %vm917_vm10 = vmor %vm886_vm8, %vm122_vm15  ;;  %500 = vmatprep.mubr.f32.mxu0 %v757_v27  ;;  %vm162_vm8 = vcmp.eq.s32.totalorder %v852_v29, %v849_v56 }
  0xb3   :  { %vm129_vm11 = vmor %vm1037_vm0, %vm117_vm7  ;;  %v45_v1 = vpop.permute.xlu1 %44 }
  0xb4   :  { %vm169_vm12 = vmor %vm129_vm11, %vm157_vm14  ;;  %vm200_vm14 = vcmp.eq.s32.totalorder %v847_v55, %v190_v7 }
  0xb5   :  { %vm209_vm15 = vmor %vm169_vm12, %vm197_vm9  ;;  %vm55_vm9 = vcmp.eq.s32.totalorder %v847_v55, %v45_v1  ;;  %vm83_vm12 = vcmp.eq.s32.totalorder %v847_v55, %v73_v13 }
  0xb6   :  { %v556_v12 = vsel %vm209_vm15, 1.0, %v757_v27  ;;  %vm173_vm1 = vmor %vm910_vm5, %vm161_vm6  ;;  %vm56_vm5 = vcmp.eq.s32.totalorder %v855_v58, %v45_v1  ;;  %vm57_vm15 = vcmp.eq.s32.totalorder %v852_v29, %v45_v1 }
  0xb7   :  { %406 = vmatmul.mubr.f32.vlgmr.msra.gmra.mrb[0].mxu1 %v556_v12  ;;  %vm213_vm7 = vmor %vm173_vm1, %vm201_vm13  ;;  %vm84_vm13 = vcmp.eq.s32.totalorder %v855_v58, %v73_v13 }
  0xb8   :  { %v560_v14 = vsel %vm213_vm7, 1.0, %v757_v27  ;;  %vm174_vm0 = vmor %vm917_vm10, %vm162_vm8  ;;  %v113_v15 = vpop.permute.xlu1 %112  ;;  %vm85_vm8 = vcmp.eq.s32.totalorder %v852_v29, %v73_v13 }
  0xb9   :  { %411 = vmatprep.mubr.f32.mxu1 %v560_v14  ;;  %vm214_vm11 = vmor %vm174_vm0, %vm202_vm3  ;;  %vm123_vm1 = vcmp.eq.s32.totalorder %v847_v55, %v113_v15  ;;  %vm124_vm0 = vcmp.eq.s32.totalorder %v855_v58, %v113_v15 }
  0xba   :  { %v561_v16 = vsel %vm214_vm11, 1.0, %v757_v27  ;;  %vm172_vm6 = vmor %vm904_vm4, %vm160_vm2  ;;  %vm125_vm2 = vcmp.eq.s32.totalorder %v852_v29, %v113_v15 }
  0xbb   :  { %501 = vmatmul.mubr.f32.gmra.mrb[2].mxu0 %v561_v16  ;;  %vm212_vm10 = vmor %vm172_vm6, %vm200_vm14 }
  0xbc   :  { %v559_v30 = vsel %vm212_vm10, 1.0, %v757_v27  ;;  %vm95_vm3 = vmor %vm55_vm9, %vm83_vm12  ;;  %506 = vmatprep.mubr.f32.mxu0 %v757_v27  ;;  %vm204_vm12 = vcmp.eq.s32.totalorder %v855_v58, %v193_v18 }
  0xbd   :  { %412 = vmatmul.mubr.f32.gmra.mrb[2].mxu1 %v559_v30  ;;  %vm96_vm7 = vmor %vm56_vm5, %vm84_vm13  ;;  %v153_v19 = vpop.permute.xlu1 %152  ;;  %vm205_vm5 = vcmp.eq.s32.totalorder %v852_v29, %v193_v18 }
  0xbe   :  { %vm97_vm4 = vmor %vm57_vm15, %vm85_vm8  ;;  %vm164_vm14 = vcmp.eq.s32.totalorder %v855_v58, %v153_v19  ;;  %vm165_vm10 = vcmp.eq.s32.totalorder %v852_v29, %v153_v19  ;;  %vm163_vm15 = vcmp.eq.s32.totalorder %v847_v55, %v153_v19 }
  0xbf   :  { %vm955_vm11 = vmor %vm95_vm3, %vm123_vm1  ;;  %vm203_vm3 = vcmp.eq.s32.totalorder %v847_v55, %v193_v18 }
  0xc0   :  { %v1039_v21 = vsel %vm955_vm11, 4294967295, %v1038_v21  ;;  %vm136_vm9 = vmor %vm96_vm7, %vm124_vm0 }
  0xc1   :  { %vm137_vm6 = vmor %vm97_vm4, %vm125_vm2  ;;  %vm1040_vm7 = vnez %v1039_v21 }
  0xc2   :  { %vm176_vm13 = vmor %vm136_vm9, %vm164_vm14  ;;  %v48_v22 = vpop.permute.xlu1 %47 }
  0xc3   :  { %vm216_vm8 = vmor %vm176_vm13, %vm204_vm12  ;;  %vm58_vm9 = vcmp.eq.s32.totalorder %v847_v55, %v48_v22  ;;  %vm59_vm12 = vcmp.eq.s32.totalorder %v855_v58, %v48_v22 }
  0xc4   :  { %v563_v23 = vsel %vm216_vm8, 1.0, %v757_v27  ;;  %vm177_vm1 = vmor %vm137_vm6, %vm165_vm10  ;;  %vm126_vm10 = vcmp.eq.s32.totalorder %v847_v55, %v116_v4 }
  0xc5   :  { %417 = vmatprep.mubr.f32.mxu1 %v563_v23  ;;  %vm217_vm11 = vmor %vm177_vm1, %vm205_vm5  ;;  %vm60_vm5 = vcmp.eq.s32.totalorder %v852_v29, %v48_v22 }
  0xc6   :  { %v564_v24 = vsel %vm217_vm11, 1.0, %v757_v27  ;;  %vm175_vm0 = vmor %vm1040_vm7, %vm163_vm15  ;;  %vm127_vm15 = vcmp.eq.s32.totalorder %v855_v58, %v116_v4 }
  0xc7   :  { %507 = vmatmul.mubr.f32.gmra.mrb[4].mxu0 %v564_v24  ;;  %vm215_vm4 = vmor %vm175_vm0, %vm203_vm3  ;;  %v76_v26 = vpop.permute.xlu1 %75  ;;  %vm128_vm3 = vcmp.eq.s32.totalorder %v852_v29, %v116_v4 }
  0xc8   :  { %v562_v25 = vsel %vm215_vm4, 1.0, %v757_v27  ;;  %512 = vmatprep.mubr.f32.mxu0 %v757_v27  ;;  %vm86_vm2 = vcmp.eq.s32.totalorder %v847_v55, %v76_v26  ;;  %vm87_vm14 = vcmp.eq.s32.totalorder %v855_v58, %v76_v26  ;;  %vm88_vm11 = vcmp.eq.s32.totalorder %v852_v29, %v76_v26 }
  0xc9   :  { %418 = vmatmul.mubr.f32.gmra.mrb[4].mxu1 %v562_v25  ;;  %vm98_vm6 = vmor %vm58_vm9, %vm86_vm2 }
  0xca   :  { %vm99_vm13 = vmor %vm59_vm12, %vm87_vm14 }
  0xcb   :  { %vm100_vm8 = vmor %vm60_vm5, %vm88_vm11 }
  0xcc   :  { %v156_v28 = vpop.permute.xlu1 %155  ;;  %vm138_vm1 = vmor %vm98_vm6, %vm126_vm10 }
  0xcd   :  { %vm167_vm7 = vcmp.eq.s32.totalorder %v855_v58, %v156_v28  ;;  %vm139_vm0 = vmor %vm99_vm13, %vm127_vm15  ;;  %vm168_vm4 = vcmp.eq.s32.totalorder %v852_v29, %v156_v28  ;;  %vm166_vm9 = vcmp.eq.s32.totalorder %v847_v55, %v156_v28 }
  0xce   :  { %vm140_vm2 = vmor %vm100_vm8, %vm128_vm3 }
  0xcf   :  { %vm179_vm12 = vmor %vm139_vm0, %vm167_vm7 }
  0xd0   :  { %vm180_vm14 = vmor %vm140_vm2, %vm168_vm4 }
  0xd1   :  { %v196_v31 = vpop.permute.xlu1 %195  ;;  %vm178_vm10 = vmor %vm138_vm1, %vm166_vm9 }
  0xd2   :  { %vm206_vm5 = vcmp.eq.s32.totalorder %v847_v55, %v196_v31  ;;  %vm207_vm11 = vcmp.eq.s32.totalorder %v855_v58, %v196_v31  ;;  %vm208_vm6 = vcmp.eq.s32.totalorder %v852_v29, %v196_v31 }
  0xd3   :  { %vm219_vm13 = vmor %vm179_vm12, %vm207_vm11 }
  0xd4   :  { %v566_v32 = vsel %vm219_vm13, 1.0, %v757_v27  ;;  %vm220_vm15 = vmor %vm180_vm14, %vm208_vm6 }
  0xd5   :  { %423 = vmatprep.mubr.f32.mxu1 %v566_v32  ;;  %v567_v33 = vsel %vm220_vm15, 1.0, %v757_v27  ;;  %vm218_vm8 = vmor %vm178_vm10, %vm206_vm5 }
  0xd6   :  { %513 = vmatmul.mubr.f32.gmra.mrb[6].mxu0 %v567_v33  ;;  %v565_v0 = vsel %vm218_vm8, 1.0, %v757_v27 }
  0xd7   :  { %424 = vmatmul.mubr.f32.gmra.mrb[6].mxu1 %v565_v0 }
 0x184   :  { %v496_v34 = vpop.f32.mrb[0].mxu0 }
 0x185   :  { %v498_v35 = vpop.f32.mrb[1].mxu0 }
 0x18a   :  { %v407_v36 = vpop.f32.mrb[0].mxu1 }
 0x18b   :  { %v497_v39 = vadd.f32 %v496_v34, %v407_v36  ;;  %v409_v40 = vpop.f32.mrb[1].mxu1 }
 0x18c   :  { %v499_v42 = vadd.f32 %v498_v35, %v409_v40 }
 0x18d   :  { %v523_v43 = vadd.f32 %v519_v38, %v497_v39 }
 0x18e   :  { %v524_v37 = vadd.f32 %v520_v41, %v499_v42  ;;  %v502_v44 = vpop.f32.mrb[2].mxu0 }
 0x18f   :  { %531 = vst [vmem:[#allocation5] sm:$0xff] %v523_v43  ;;  %v504_v27 = vpop.f32.mrb[3].mxu0 }
 0x190   :  { %532 = vst [vmem:[#allocation5 + $0x8] sm:$0xff] %v524_v37  ;;  %v413_v45 = vpop.f32.mrb[2].mxu1 }
 0x191   :  { %v503_v47 = vadd.f32 %v502_v44, %v413_v45  ;;  %v415_v48 = vpop.f32.mrb[3].mxu1 }
 0x192   :  { %v505_v50 = vadd.f32 %v504_v27, %v415_v48 }
 0x193   :  { %v525_v20 = vadd.f32 %v521_v46, %v503_v47 }
 0x194   :  { %v526_v51 = vadd.f32 %v522_v49, %v505_v50 }
 0x195   :  { %533 = vst [vmem:[#allocation5 + $0x10] sm:$0xff] %v525_v20 }
 0x196   :  { %534 = vst [vmem:[#allocation5 + $0x18] sm:$0xff] %v526_v51 }
 0x19a   :  { %v508_v52 = vpop.f32.mrb[4].mxu0 }
 0x19b   :  { %v510_v53 = vpop.f32.mrb[5].mxu0 }
 0x19c   :  { %v419_v54 = vpop.f32.mrb[4].mxu1 }
 0x19d   :  { %v509_v17 = vadd.f32 %v508_v52, %v419_v54  ;;  %v421_v55 = vpop.f32.mrb[5].mxu1 }
 0x19e   :  { %v511_v56 = vadd.f32 %v510_v53, %v421_v55 }
 0x19f   :  { %v527_v29 = vadd.f32 %v519_v38, %v509_v17 }
 0x1a0   :  { %v528_v57 = vadd.f32 %v520_v41, %v511_v56 }
 0x1a1   :  { %535 = vst [vmem:[#allocation5 + $0x20] sm:$0xff] %v527_v29 }
 0x1a2   :  { %536 = vst [vmem:[#allocation5 + $0x28] sm:$0xff] %v528_v57 }
 0x1a9   :  { %v514_v58 = vpop.f32.mrb[6].mxu0 }
 0x1aa   :  { %v425_v59 = vpop.f32.mrb[6].mxu1  ;;  %v516_v60 = vpop.f32.mrb[7].mxu0 }
 0x1ab   :  { %v515_v61 = vadd.f32 %v514_v58, %v425_v59  ;;  %v427_v62 = vpop.f32.mrb[7].mxu1 }
 0x1ac   :  { %v517_v63 = vadd.f32 %v516_v60, %v427_v62 }
 0x1ad   :  { %v529_v2 = vadd.f32 %v521_v46, %v515_v61 }
 0x1ae   :  { %v530_v3 = vadd.f32 %v522_v49, %v517_v63 }
 0x1af   :  { %537 = vst [vmem:[#allocation5 + $0x30] sm:$0xff] %v529_v2 }
 0x1b0   :  { %538 = vst [vmem:[#allocation5 + $0x38] sm:$0xff] %v530_v3 }
 0x1b1   :  { %734 = shalt.err (!%p731_p12)
}
 0x1b2   :  { %s735_s17 = scalar_lea.hbm %s1019_s3, 1024 }
 0x1b3   :  { %p736_p13 = scmp.ne.s32.totalorder %s1019_s3, %s735_s17  ;;  %p739_p0 = scmp.lt.u32.totalorder %s735_s17, %s1019_s3 }
 0x1b5   :  { %p741_p1 = pnand %p739_p0, %p736_p13 }
 0x1b7   :  { %744 = shalt.err (!%p741_p1)
}
 0x1b8   :  { %550 = dma.vmem_to_hbm [thread:$0]  %s545_s13, 1024, %s1019_s3, [#allocation4], %s750_s22, %s750_s22, %s751_s23  }
 0x1b9   :  { %747 = dma.done.wait [#allocation4], 1024  }
 0x1ba   :  { %748 = vsyncadd [#allocation4], 4294966272 }
 0x1bb   :  { %554 = vsyncpa [#allocation3], 1 }
 0x1bc   :  { %555 = vsyncpa [#allocation4], 1 }

</bundles_post_ra>
